<compile_context>
chip_gen: v5e
topology: v5e:2x2
jax: 0.10.0
libtpu: 0.0.40
codegen_flags: <defaults>
</compile_context>

<pallas_src>
import math

import numpy as np
import jax
import jax.numpy as jnp
from jax import lax
from jax.experimental import pallas as pl
from jax.experimental.pallas import tpu as pltpu


def _round_up(a, b):
    return ((a + b - 1) // b) * b


# ----------------------------------------------------------------------------
# Kernel: tiled pairwise SQUARED Euclidean distance matrix, K-axis tiled.
#   d2[i, j] = max(||x_i||^2 + ||x_j||^2 - 2 <x_i, x_j>, 1e-12)
# ----------------------------------------------------------------------------
def _pairwise_d2_kernel(xr_ref, xc_ref, sqr_ref, sqc_ref, d2_ref, acc_ref):
    k = pl.program_id(2)

    @pl.when(k == 0)
    def _():
        acc_ref[...] = jnp.zeros_like(acc_ref)

    # Contract the feature axis of both tiles directly on the MXU
    # (no explicit transpose expressed -> no XLU transpose), f32 accumulate.
    acc_ref[...] += lax.dot_general(
        xr_ref[...], xc_ref[...],
        dimension_numbers=(((1,), (1,)), ((), ())),
        preferred_element_type=jnp.float32)

    @pl.when(k == pl.num_programs(2) - 1)
    def _():
        d2 = sqr_ref[...] + sqc_ref[...] - 2.0 * acc_ref[...]
        d2_ref[...] = jnp.maximum(d2, 1e-12)   # clamp the SQUARED distance, no sqrt


def _pick_tiling(n, d, mm_itemsize):
    """Generation-aware N-tile / K-tile / VMEM-limit selection."""
    try:
        vmem_cap = int(pltpu.get_tpu_info().vmem_capacity_bytes)
    except Exception:
        vmem_cap = 64 * 1024 * 1024
    # Headroom for compiler-internal scratch: ~48 MiB on v7x (64 MiB physical),
    # ~96 MiB on v5e/v6e (128 MiB physical).
    budget = min((vmem_cap * 3) // 4, 96 * 1024 * 1024)

    # Bigger N-tiles halve the column-operand re-fetch and per-step overhead;
    # K-tiling below keeps the footprint bounded regardless of D.
    if n >= 512:
        tile = 512
    elif n >= 256:
        tile = 256
    else:
        tile = 128
    n_pad = _round_up(max(n, 1), tile)
    d_pad = _round_up(max(d, 1), 128)

    def footprint(tk):
        return (2 * 2 * tile * tk * mm_itemsize     # 2 operands, double-buffered
                + 2 * tile * tile * 4               # output tile, double-buffered
                + tile * tile * 4                   # f32 accumulator scratch
                + 4 * tile * 4)                     # norm tiles (negligible)

    # Prefer tk == d_pad: then the row tile's block index is constant across
    # the inner j axis and Pallas skips its re-DMA.  K-tile only if VMEM-bound.
    tk = d_pad
    if footprint(tk) > budget:
        tk = 128
        for cand in (4096, 2048, 1024, 512, 256):
            if cand <= d_pad and d_pad % cand == 0 and footprint(cand) <= budget:
                tk = cand
                break
    return tile, n_pad, d_pad, tk, budget


def pairwise_sqdist(x, matmul_dtype=jnp.bfloat16):
    """Returns the (n, n) clamped squared-distance matrix (float32)."""
    n, d = x.shape
    mm_itemsize = jnp.dtype(matmul_dtype).itemsize
    tile, n_pad, d_pad, tk, vmem_limit = _pick_tiling(n, d, mm_itemsize)

    # Zero padding does not change pairwise distances between the real rows.
    xp = jnp.pad(x, ((0, n_pad - n), (0, d_pad - d)))
    xf = xp.astype(jnp.float32)
    x_mm = xp.astype(matmul_dtype)                        # MXU-native operands
    sq_row = jnp.sum(xf * xf, axis=1, keepdims=True)      # (Np, 1) f32
    sq_col = sq_row.reshape(1, n_pad)                     # (1, Np) f32

    nt = n_pad // tile
    grid = (nt, nt, d_pad // tk)
    cost = pl.CostEstimate(
        flops=2 * n_pad * n_pad * d_pad,
        transcendentals=0,
        # Operands are re-fetched ~nt times across the outer grid axes.
        bytes_accessed=(2 * nt * n_pad * d_pad * mm_itemsize
                        + n_pad * n_pad * 4
                        + 2 * nt * n_pad * 4))

    # TODO(synk): for N in the thousands, exploit d2 symmetry (j>=i tiles only)
    # and add a fused per-row top-k output so only O(N*k) values go to host.
    d2 = pl.pallas_call(
        _pairwise_d2_kernel,
        out_shape=jax.ShapeDtypeStruct((n_pad, n_pad), jnp.float32),
        grid=grid,
        in_specs=[
            pl.BlockSpec((tile, tk), lambda i, j, k: (i, k)),   # row tile
            pl.BlockSpec((tile, tk), lambda i, j, k: (j, k)),   # col tile
            pl.BlockSpec((tile, 1), lambda i, j, k: (i, 0)),    # ||row||^2
            pl.BlockSpec((1, tile), lambda i, j, k: (0, j)),    # ||col||^2
        ],
        out_specs=pl.BlockSpec((tile, tile), lambda i, j, k: (i, j)),
        scratch_shapes=[pltpu.VMEM((tile, tile), jnp.float32)],
        compiler_params=pltpu.CompilerParams(
            dimension_semantics=("parallel", "parallel", "arbitrary"),
            vmem_limit_bytes=int(vmem_limit)),
        cost_estimate=cost,
    )(x_mm, x_mm, sq_row, sq_col)

    return d2[:n, :n]


# ----------------------------------------------------------------------------
# Host-side wrapper reproducing RobustTripletLoss_final.forward semantics.
# ----------------------------------------------------------------------------
# TODO(synk): the data-dependent random triplet selection (np.random.choice +
# while loops + false-negative relabeling) has no clean Pallas equivalent; it
# is host control flow in the PyTorch reference as well and stays on host.
def robust_triplet_loss_final(inputs, prediction, targets, true_targets, prob,
                              threshold, margin, np_rng):
    del true_targets  # unused by the reference forward()
    n = int(inputs.shape[0])

    # ---- Pallas hot path: pairwise SQUARED distance matrix ----
    d2_dev = pairwise_sqdist(inputs)
    d2 = np.asarray(jax.device_get(d2_dev))

    targets_np = np.asarray(jax.device_get(targets))
    pred_np = np.asarray(jax.device_get(prediction))
    prob_np = np.asarray(jax.device_get(prob))

    is_confident = prob_np >= threshold

    def dist_of(i, j):  # sqrt only for the O(cnt) selected entries
        return math.sqrt(float(d2[i, j]))

    dist_ap, dist_an, inv_flags = [], [], []
    for i in range(n):
        if not is_confident[i]:
            continue
        pos_idx = np.nonzero(targets_np == targets_np[i])[0]
        neg_idx = np.nonzero(targets_np != targets_np[i])[0]

        rp = int(np_rng.choice(pos_idx, 1).item())
        while rp == i:
            rp = int(np_rng.choice(pos_idx, 1).item())

        # argsort of d^2 is rank-equivalent to argsort of sqrt(d^2)
        rank_neg = np.argsort(d2[i][neg_idx])
        hn = int(neg_idx[rank_neg[0]])

        ap = dist_of(i, rp)
        an = dist_of(i, hn)
        loss_inverse = False

        if prob_np[rp] >= threshold and prob_np[hn] >= threshold:
            pass
        elif prob_np[rp] >= threshold and prob_np[hn] < threshold:
            is_fn = int(np.argmax(pred_np[hn])) == int(targets_np[i])
            if is_fn:
                j = 1
                hn_new = int(neg_idx[rank_neg[1]])
                loop_cnt = 0
                while prob_np[hn_new] < threshold:
                    j += 1
                    hn_new = int(neg_idx[rank_neg[j]])
                    loop_cnt += 1
                    if loop_cnt >= 10:
                        break
                ap = (dist_of(i, rp) + dist_of(i, hn)) / 2.0
                an = dist_of(i, hn_new)
        elif prob_np[rp] < threshold and prob_np[hn] >= threshold:
            rp_new = int(np_rng.choice(pos_idx, 1).item())
            loop_cnt = 0
            while rp_new == i or prob_np[rp_new] < threshold:
                rp_new = int(np_rng.choice(pos_idx, 1).item())
                loop_cnt += 1
                if loop_cnt >= 5:
                    break
            an = (dist_of(i, rp) + dist_of(i, hn)) / 2.0
            ap = dist_of(i, rp_new)
        else:  # both below threshold
            is_fn = int(np.argmax(pred_np[hn])) == int(targets_np[i])
            if is_fn:
                loss_inverse = True
            else:
                rp_new = int(np_rng.choice(pos_idx, 1).item())
                loop_cnt = 0
                while rp_new == i or prob_np[rp_new] < threshold:
                    rp_new = int(np_rng.choice(pos_idx, 1).item())
                    loop_cnt += 1
                    if loop_cnt >= 5:
                        break
                an = (dist_of(i, rp) + dist_of(i, hn)) / 2.0
                ap = dist_of(i, rp_new)

        dist_ap.append(ap)
        dist_an.append(an)
        inv_flags.append(loss_inverse)

    cnt = len(dist_ap)
    if cnt == 0:
        return jnp.array([0.0], dtype=jnp.float32), 0, cnt

    # O(cnt) hinge + correct count: host numpy (a Pallas launch here is pure
    # overhead — tens of us of H2D/launch/D2H for sub-us of compute).
    ap_np = np.asarray(dist_ap, dtype=np.float32)
    an_np = np.asarray(dist_an, dtype=np.float32)
    sign = np.where(np.asarray(inv_flags), -1.0, 1.0).astype(np.float32)
    hinge = np.maximum(sign * (ap_np - an_np) + float(margin), 0.0)
    loss = jnp.array([float(hinge.sum()) / cnt], dtype=jnp.float32)
    correct = int(np.sum(an_np >= ap_np))
    return loss, correct, cnt


if __name__ == "__main__":
    batch, feat, num_classes = 8, 32, 2
    margin = 0.3
    threshold = 0.5

    key = jax.random.PRNGKey(0)
    k1, k2 = jax.random.split(key)

    inputs = jax.random.normal(k1, (batch, feat), dtype=jnp.float32)
    prediction = jax.random.normal(k2, (batch, num_classes), dtype=jnp.float32)
    targets = jnp.array([0, 0, 0, 0, 1, 1, 1, 1], dtype=jnp.int32)
    true_targets = targets
    prob = jnp.array([0.9, 0.8, 0.95, 0.7, 0.85, 0.9, 0.75, 0.3],
                     dtype=jnp.float32)

    np_rng = np.random.RandomState(0)  # deterministic triplet sampling

    loss, correct, cnt = robust_triplet_loss_final(
        inputs, prediction, targets, true_targets, prob, threshold, margin,
        np_rng)
    loss = jax.block_until_ready(loss)
    _ = float(loss[0]), int(correct), int(cnt)
    print("KERNEL_OK")
</pallas_src>

<mosaic_0001>
module attributes {stable_mosaic.version = 11 : i64} {
  func.func @_pairwise_d2_kernel(%arg0: i32, %arg1: i32, %arg2: i32, %arg3: memref<128x128xbf16, #tpu.memory_space<vmem>>, %arg4: memref<128x128xbf16, #tpu.memory_space<vmem>>, %arg5: memref<128x1xf32, #tpu.memory_space<vmem>>, %arg6: memref<1x128xf32, #tpu.memory_space<vmem>>, %arg7: memref<128x128xf32, #tpu.memory_space<vmem>>, %arg8: memref<128x128xf32, #tpu.memory_space<vmem>>) attributes {dimension_semantics = [#tpu.dimension_semantics<parallel>, #tpu.dimension_semantics<parallel>, #tpu.dimension_semantics<arbitrary>], iteration_bounds = array<i64: 1, 1, 1>, scalar_prefetch = 0 : i64, scratch_operands = 1 : i64, tpu.core_type = #tpu.core_type<tc>, window_params = [{transform_indices = @transform_0, window_bounds = array<i64: 128, 128>}, {transform_indices = @transform_1, window_bounds = array<i64: 128, 128>}, {transform_indices = @transform_2, window_bounds = array<i64: 128, 1>}, {transform_indices = @transform_3, window_bounds = array<i64: 1, 128>}, {transform_indices = @transform_4, window_bounds = array<i64: 128, 128>}]} {
    %c0_i32 = arith.constant 0 : i32
    %0 = arith.cmpi eq, %arg2, %c0_i32 : i32
    %1 = arith.extui %0 : i1 to i32
    %c0_i32_0 = arith.constant 0 : i32
    %2 = arith.cmpi ne, %1, %c0_i32_0 : i32
    scf.if %2 {
      %cst_10 = arith.constant 0.000000e+00 : f32
      %12 = vector.broadcast %cst_10 : f32 to vector<128x128xf32>
      %c0_11 = arith.constant 0 : index
      %c0_12 = arith.constant 0 : index
      %13 = vector.load %arg8[%c0_11, %c0_12] : memref<128x128xf32, #tpu.memory_space<vmem>>, vector<128x128xf32>
      tpu.vector_store %arg8[%c0_11, %c0_12], %12 {strides = array<i32>} : memref<128x128xf32, #tpu.memory_space<vmem>>, vector<128x128xf32>,
    } else {
    }
    %c0 = arith.constant 0 : index
    %c0_1 = arith.constant 0 : index
    %3 = vector.load %arg8[%c0, %c0_1] : memref<128x128xf32, #tpu.memory_space<vmem>>, vector<128x128xf32>
    %c0_2 = arith.constant 0 : index
    %c0_3 = arith.constant 0 : index
    %4 = vector.load %arg3[%c0_2, %c0_3] : memref<128x128xbf16, #tpu.memory_space<vmem>>, vector<128x128xbf16>
    %c0_4 = arith.constant 0 : index
    %c0_5 = arith.constant 0 : index
    %5 = vector.load %arg4[%c0_4, %c0_5] : memref<128x128xbf16, #tpu.memory_space<vmem>>, vector<128x128xbf16>
    %cst = arith.constant dense<0.000000e+00> : vector<128x128xf32>
    %6 = tpu.matmul %4, %5, %cst {dimension_numbers = #tpu.dot_dimension_numbers<[1], [1], [0], [0], [0, 0, 1, 0], [], []>} : vector<128x128xbf16>, vector<128x128xbf16>, vector<128x128xf32> -> vector<128x128xf32>
    %7 = arith.addf %3, %6 : vector<128x128xf32>
    %c0_6 = arith.constant 0 : index
    %c0_7 = arith.constant 0 : index
    %8 = vector.load %arg8[%c0_6, %c0_7] : memref<128x128xf32, #tpu.memory_space<vmem>>, vector<128x128xf32>
    tpu.vector_store %arg8[%c0_6, %c0_7], %7 {strides = array<i32>} : memref<128x128xf32, #tpu.memory_space<vmem>>, vector<128x128xf32>,
    %c0_i32_8 = arith.constant 0 : i32
    %9 = arith.cmpi eq, %arg2, %c0_i32_8 : i32
    %10 = arith.extui %9 : i1 to i32
    %c0_i32_9 = arith.constant 0 : i32
    %11 = arith.cmpi ne, %10, %c0_i32_9 : i32
    scf.if %11 {
      %c0_10 = arith.constant 0 : index
      %c0_11 = arith.constant 0 : index
      %12 = vector.load %arg5[%c0_10, %c0_11] : memref<128x1xf32, #tpu.memory_space<vmem>>, vector<128x1xf32>
      %c0_12 = arith.constant 0 : index
      %c0_13 = arith.constant 0 : index
      %13 = vector.load %arg6[%c0_12, %c0_13] : memref<1x128xf32, #tpu.memory_space<vmem>>, vector<1x128xf32>
      %14 = vector.broadcast %12 : vector<128x1xf32> to vector<128x128xf32>
      %15 = vector.broadcast %13 : vector<1x128xf32> to vector<128x128xf32>
      %16 = arith.addf %14, %15 : vector<128x128xf32>
      %c0_14 = arith.constant 0 : index
      %c0_15 = arith.constant 0 : index
      %17 = vector.load %arg8[%c0_14, %c0_15] : memref<128x128xf32, #tpu.memory_space<vmem>>, vector<128x128xf32>
      %cst_16 = arith.constant 2.000000e+00 : f32
      %18 = vector.broadcast %cst_16 : f32 to vector<128x128xf32>
      %19 = arith.mulf %18, %17 : vector<128x128xf32>
      %20 = arith.subf %16, %19 : vector<128x128xf32>
      %cst_17 = arith.constant 9.99999996E-13 : f32
      %21 = vector.broadcast %cst_17 : f32 to vector<128x128xf32>
      %22 = arith.maximumf %20, %21 : vector<128x128xf32>
      %c0_18 = arith.constant 0 : index
      %c0_19 = arith.constant 0 : index
      %23 = vector.load %arg7[%c0_18, %c0_19] : memref<128x128xf32, #tpu.memory_space<vmem>>, vector<128x128xf32>
      tpu.vector_store %arg7[%c0_18, %c0_19], %22 {strides = array<i32>} : memref<128x128xf32, #tpu.memory_space<vmem>>, vector<128x128xf32>,
    } else {
    }
    return
  }
  func.func @transform_0(%arg0: i32, %arg1: i32, %arg2: i32) -> (i32, i32) {
    %c0_i32 = arith.constant 0 : i32
    return %arg0, %arg2 : i32, i32
  }
  func.func @transform_1(%arg0: i32, %arg1: i32, %arg2: i32) -> (i32, i32) {
    %c0_i32 = arith.constant 0 : i32
    return %arg1, %arg2 : i32, i32
  }
  func.func @transform_2(%arg0: i32, %arg1: i32, %arg2: i32) -> (i32, i32) {
    %c0_i32 = arith.constant 0 : i32
    %c0_i32_0 = arith.constant 0 : i32
    return %arg0, %c0_i32 : i32, i32
  }
  func.func @transform_3(%arg0: i32, %arg1: i32, %arg2: i32) -> (i32, i32) {
    %c0_i32 = arith.constant 0 : i32
    %c0_i32_0 = arith.constant 0 : i32
    return %c0_i32, %arg1 : i32, i32
  }
  func.func @transform_4(%arg0: i32, %arg1: i32, %arg2: i32) -> (i32, i32) {
    %c0_i32 = arith.constant 0 : i32
    return %arg0, %arg1 : i32, i32
  }
}

</mosaic_0001>

<bundles_post_ra>
// kernel: tpu_custom_call.1
= control target key start
LH: loop header
LB: loop body
LE: loop exit
PB: predicated region body
PF: predicated region fallthrough
CT: control target
= control target key end

     0   :  { %v618_v1 = vmov 0   ;;  %s773_s0 = inlined_call_operand.vmem [shape: bf16[128,128], index: 0, kind: input, shape index: {}]   ;;  %s774_s1 = inlined_call_operand.vmem [shape: bf16[128,128], index: 1, kind: input, shape index: {}]   ;;  %s775_s2 = inlined_call_operand.vmem [shape: f32[128,1], index: 2, kind: input, shape index: {}]   ;;  %s776_s3 = inlined_call_operand.vmem [shape: f32[1,128], index: 3, kind: input, shape index: {}]   ;;  %s777_s4 = inlined_call_operand.hbm [shape: f32[128,128], index: 4, kind: output, shape index: {}]  }
   0x1   :  { %v559_v0 = vld [vmem:[%s774_s1 + $0x38] sm:$0xff]  ;;  %588 = vset.pattern.permute.xlu0 %v618_v1  ;;  %v266_v2 = vld [vmem:[%s775_s2] sm:$0xff]  ;;  %589 = vset.pattern.permute.xlu1 %v618_v1 }
   0x2   :  { %182 = vmatpush.bf16.xpose.msra.mxu0 %v559_v0  ;;  %560 = vmatpush.bf16.xpose.msra.mxu1 %v559_v0 }
   0x3   :  { %9 = vsyncpa [#allocation4], 0  ;;  %561 = vmatpush.bf16.xpose.msra.mxu2 %v559_v0  ;;  %562 = vmatpush.bf16.xpose.msra.mxu3 %v559_v0  ;;  %v268_v3 = vld [vmem:[%s775_s2 + $0x10] sm:$0xff]  ;;  %v267_v5 = vld [vmem:[%s775_s2 + $0x8] sm:$0xff]  ;;  %s468_s29 = sshll.u32 %s777_s4, 4  ;;  %s620_s30 = smov 128   ;;  %s469_s29 = int_to_ptr.hbm [resolvable:$true] %s468_s29 }
   0x4   :  { %285 = vperm.xlu0 %588, %v266_v2   ;;  %295 = vperm.xlu1 %589, %v268_v3   ;;  %v558_v4 = vld [vmem:[%s774_s1 + $0x30] sm:$0xff]  ;;  %v269_v6 = vld [vmem:[%s775_s2 + $0x18] sm:$0xff]  ;;  %v557_v7 = vld [vmem:[%s774_s1 + $0x28] sm:$0xff]  ;;  %s621_s5 = smov 8  }
   0x5   :  { %590 = vset.pattern.permute.xlu2 %v618_v1  ;;  %v272_v8 = vld [vmem:[%s775_s2 + $0x30] sm:$0xff]  ;;  %v273_v9 = vld [vmem:[%s775_s2 + $0x38] sm:$0xff]  ;;  %v556_v10 = vld [vmem:[%s774_s1 + $0x20] sm:$0xff] }
   0x6   :  { %v275_v11 = vld [vmem:[%s775_s2 + $0x48] sm:$0xff]  ;;  %v555_v12 = vld [vmem:[%s774_s1 + $0x18] sm:$0xff]  ;;  %v278_v13 = vld [vmem:[%s775_s2 + $0x60] sm:$0xff] }
   0x7   :  { %v270_v14 = vld [vmem:[%s775_s2 + $0x20] sm:$0xff]  ;;  %v276_v15 = vld [vmem:[%s775_s2 + $0x50] sm:$0xff]  ;;  %v281_v17 = vld [vmem:[%s775_s2 + $0x78] sm:$0xff] }
   0x8   :  { %305 = vperm.xlu2 %590, %v270_v14   ;;  %v554_v16 = vld [vmem:[%s774_s1 + $0x10] sm:$0xff]  ;;  %v271_v18 = vld [vmem:[%s775_s2 + $0x28] sm:$0xff]  ;;  %v274_v21 = vld [vmem:[%s775_s2 + $0x40] sm:$0xff] }
   0x9   :  { %v279_v19 = vld [vmem:[%s775_s2 + $0x68] sm:$0xff]  ;;  %v552_v22 = vld [vmem:[%s774_s1] sm:$0xff]  ;;  %v277_v23 = vld [vmem:[%s775_s2 + $0x58] sm:$0xff] }
   0xa   :  { %183 = vmatpush.bf16.xpose.msra.mxu0 %v558_v4  ;;  %563 = vmatpush.bf16.xpose.msra.mxu1 %v558_v4  ;;  %v553_v20 = vld [vmem:[%s774_s1 + $0x8] sm:$0xff]  ;;  %v544_v24 = vld [vmem:[%s773_s0] sm:$0xff]  ;;  %v546_v25 = vld [vmem:[%s773_s0 + $0x10] sm:$0xff] }
   0xb   :  { %564 = vmatpush.bf16.xpose.msra.mxu2 %v558_v4  ;;  %565 = vmatpush.bf16.xpose.msra.mxu3 %v558_v4  ;;  %v548_v26 = vld [vmem:[%s773_s0 + $0x20] sm:$0xff]  ;;  %v550_v27 = vld [vmem:[%s773_s0 + $0x30] sm:$0xff]  ;;  %v545_v29 = vld [vmem:[%s773_s0 + $0x8] sm:$0xff] }
   0xc   :  { %290 = vperm.xlu0 %588, %v267_v5   ;;  %300 = vperm.xlu1 %589, %v269_v6   ;;  %v280_v28 = vld [vmem:[%s775_s2 + $0x70] sm:$0xff]  ;;  %v547_v30 = vld [vmem:[%s773_s0 + $0x18] sm:$0xff]  ;;  %v549_v31 = vld [vmem:[%s773_s0 + $0x28] sm:$0xff] }
   0xd   :  { %v551_v32 = vld [vmem:[%s773_s0 + $0x38] sm:$0xff]  ;;  %v750_v42 = vld [vmem:[%s776_s3] ss:$0 sm:$0xff]  ;;  %s619_s0 = smov [#allocation3]  }
   0xe   :  { %s466_s3 = sshll.u32 %s619_s0, 4  ;;  %s467_s3 = int_to_ptr.vmem [resolvable:$true] %s466_s3 }
  0x10   :  { %310 = vperm.xlu2 %590, %v271_v18  }
  0x12   :  { %184 = vmatpush.bf16.xpose.msra.mxu0 %v557_v7  ;;  %566 = vmatpush.bf16.xpose.msra.mxu1 %v557_v7 }
  0x13   :  { %567 = vmatpush.bf16.xpose.msra.mxu2 %v557_v7  ;;  %568 = vmatpush.bf16.xpose.msra.mxu3 %v557_v7 }
  0x14   :  { %315 = vperm.xlu0 %588, %v272_v8   ;;  %320 = vperm.xlu1 %589, %v273_v9  }
  0x18   :  { %325 = vperm.xlu2 %590, %v274_v21  }
  0x1a   :  { %185 = vmatpush.bf16.xpose.msra.mxu0 %v556_v10  ;;  %569 = vmatpush.bf16.xpose.msra.mxu1 %v556_v10 }
  0x1b   :  { %570 = vmatpush.bf16.xpose.msra.mxu2 %v556_v10  ;;  %571 = vmatpush.bf16.xpose.msra.mxu3 %v556_v10 }
  0x1c   :  { %330 = vperm.xlu0 %588, %v275_v11   ;;  %335 = vperm.xlu1 %589, %v276_v15  }
  0x20   :  { %340 = vperm.xlu2 %590, %v277_v23  }
  0x22   :  { %186 = vmatpush.bf16.xpose.msra.mxu0 %v555_v12  ;;  %572 = vmatpush.bf16.xpose.msra.mxu1 %v555_v12 }
  0x23   :  { %573 = vmatpush.bf16.xpose.msra.mxu2 %v555_v12  ;;  %574 = vmatpush.bf16.xpose.msra.mxu3 %v555_v12 }
  0x24   :  { %345 = vperm.xlu0 %588, %v278_v13   ;;  %350 = vperm.xlu1 %589, %v279_v19  }
  0x28   :  { %355 = vperm.xlu2 %590, %v280_v28  }
  0x2a   :  { %187 = vmatpush.bf16.xpose.msra.mxu0 %v554_v16  ;;  %575 = vmatpush.bf16.xpose.msra.mxu1 %v554_v16 }
  0x2b   :  { %576 = vmatpush.bf16.xpose.msra.mxu2 %v554_v16  ;;  %577 = vmatpush.bf16.xpose.msra.mxu3 %v554_v16 }
  0x2c   :  { %360 = vperm.xlu0 %588, %v281_v17  }
  0x32   :  { %188 = vmatpush.bf16.xpose.msra.mxu0 %v553_v20  ;;  %578 = vmatpush.bf16.xpose.msra.mxu1 %v553_v20 }
  0x33   :  { %579 = vmatpush.bf16.xpose.msra.mxu2 %v553_v20  ;;  %580 = vmatpush.bf16.xpose.msra.mxu3 %v553_v20 }
  0x3a   :  { %189 = vmatpush.bf16.xpose.msra.mxu0 %v552_v22  ;;  %581 = vmatpush.bf16.xpose.msra.mxu1 %v552_v22 }
  0x3b   :  { %582 = vmatpush.bf16.xpose.msra.mxu2 %v552_v22  ;;  %583 = vmatpush.bf16.xpose.msra.mxu3 %v552_v22 }
  0x41   :  { %190 = vmatmul.bf16.vlgmr.msra.gmra.mxu0 %v544_v24  ;;  %200 = vmatmul.bf16.vlgmr.msra.gmra.mxu1 %v546_v25 }
  0x42   :  { %210 = vmatmul.bf16.vlgmr.msra.gmra.mxu2 %v548_v26  ;;  %220 = vmatmul.bf16.vlgmr.msra.gmra.mxu3 %v550_v27 }
  0x51   :  { %195 = vmatmul.bf16.gmra.mxu0 %v545_v29  ;;  %205 = vmatmul.bf16.gmra.mxu1 %v547_v30 }
  0x52   :  { %215 = vmatmul.bf16.gmra.mxu2 %v549_v31  ;;  %225 = vmatmul.bf16.gmra.mxu3 %v551_v32 }
  0x62   :  { %v306_v36 = vpop.permute.xlu2 %305 }
  0x63   :  { %v370_v46 = vadd.f32 %v750_v42, %v306_v36 }
  0x6a   :  { %v311_v39 = vpop.permute.xlu2 %310 }
  0x6b   :  { %v371_v1 = vadd.f32 %v750_v42, %v311_v39 }
  0x72   :  { %v326_v47 = vpop.permute.xlu2 %325 }
  0x73   :  { %v374_v58 = vadd.f32 %v750_v42, %v326_v47 }
  0x76   :  { %v286_v33 = vpop.permute.xlu0 %285  ;;  %v296_v34 = vpop.permute.xlu1 %295 }
  0x77   :  { %v366_v45 = vadd.f32 %v750_v42, %v286_v33  ;;  %v368_v22 = vadd.f32 %v750_v42, %v296_v34 }
  0x7a   :  { %v341_v6 = vpop.permute.xlu2 %340 }
  0x7e   :  { %v291_v35 = vpop.permute.xlu0 %290  ;;  %v743_v37 = vpop.permute.xlu1 %300 }
  0x7f   :  { %v367_v0 = vadd.f32 %v750_v42, %v291_v35 }
  0x82   :  { %v356_v32 = vpop.permute.xlu2 %355 }
  0x86   :  { %v316_v38 = vpop.permute.xlu0 %315  ;;  %v745_v40 = vpop.permute.xlu1 %320 }
  0x87   :  { %v372_v23 = vadd.f32 %v750_v42, %v316_v38  ;;  %v380_v38 = vadd.f32 %v750_v42, %v356_v32  ;;  %v373_v47 = vadd.f32 %v750_v42, %v745_v40 }
  0x8e   :  { %v331_v41 = vpop.permute.xlu0 %330  ;;  %v336_v50 = vpop.permute.xlu1 %335 }
  0x8f   :  { %v375_v16 = vadd.f32 %v750_v42, %v331_v41  ;;  %v376_v34 = vadd.f32 %v750_v42, %v336_v50 }
  0x96   :  { %v346_v55 = vpop.permute.xlu0 %345  ;;  %v351_v11 = vpop.permute.xlu1 %350 }
  0x97   :  { %v378_v59 = vadd.f32 %v750_v42, %v346_v55  ;;  %v379_v17 = vadd.f32 %v750_v42, %v351_v11 }
  0xbe   :  { %v191_v43 = vpop.f32.mrf.mxu0  ;;  %v201_v44 = vpop.f32.mrf.mxu1 }
  0xbf   :  { %v398_v48 = vmul.f32 2.0, %v191_v43  ;;  %v402_v49 = vmul.f32 2.0, %v201_v44 }
  0xc1   :  { %v414_v51 = vsub.f32 %v366_v45, %v398_v48  ;;  %v418_v52 = vsub.f32 %v370_v46, %v402_v49  ;;  %v369_v46 = vadd.f32 %v750_v42, %v743_v37  ;;  %v377_v37 = vadd.f32 %v750_v42, %v341_v6 }
  0xc3   :  { %v430_v53 = vmax.f32 %v414_v51, 1e-12  ;;  %v434_v54 = vmax.f32 %v418_v52, 1e-12 }
  0xc5   :  { %446 = vst [vmem:[#allocation3] sm:$0xff] %v430_v53  ;;  %v211_v56 = vpop.f32.mrf.mxu2  ;;  %v221_v57 = vpop.f32.mrf.mxu3 }
  0xc6   :  { %450 = vst [vmem:[#allocation3 + $0x20] sm:$0xff] %v434_v54  ;;  %v406_v60 = vmul.f32 2.0, %v211_v56  ;;  %v410_v61 = vmul.f32 2.0, %v221_v57  ;;  %v193_v62 = vpop.f32.mrf.mxu0  ;;  %v203_v63 = vpop.f32.mrf.mxu1 }
  0xc7   :  { %v399_v2 = vmul.f32 2.0, %v193_v62  ;;  %v403_v3 = vmul.f32 2.0, %v203_v63  ;;  %v361_v56 = vpop.permute.xlu0 %360 }
  0xc8   :  { %v422_v4 = vsub.f32 %v374_v58, %v406_v60  ;;  %v426_v5 = vsub.f32 %v378_v59, %v410_v61  ;;  %v381_v40 = vadd.f32 %v750_v42, %v361_v56 }
  0xc9   :  { %v415_v7 = vsub.f32 %v367_v0, %v399_v2  ;;  %v419_v8 = vsub.f32 %v371_v1, %v403_v3 }
  0xca   :  { %v438_v9 = vmax.f32 %v422_v4, 1e-12  ;;  %v442_v10 = vmax.f32 %v426_v5, 1e-12 }
  0xcb   :  { %v431_v12 = vmax.f32 %v415_v7, 1e-12  ;;  %v435_v13 = vmax.f32 %v419_v8, 1e-12 }
  0xcc   :  { %454 = vst [vmem:[#allocation3 + $0x40] sm:$0xff] %v438_v9 }
  0xcd   :  { %458 = vst [vmem:[#allocation3 + $0x60] sm:$0xff] %v442_v10  ;;  %v213_v14 = vpop.f32.mrf.mxu2  ;;  %v223_v15 = vpop.f32.mrf.mxu3 }
  0xce   :  { %447 = vst [vmem:[#allocation3 + $0x8] sm:$0xff] %v431_v12  ;;  %v407_v18 = vmul.f32 2.0, %v213_v14  ;;  %v411_v19 = vmul.f32 2.0, %v223_v15  ;;  %v196_v20 = vpop.f32.mrf.mxu0  ;;  %v206_v21 = vpop.f32.mrf.mxu1 }
  0xcf   :  { %451 = vst [vmem:[#allocation3 + $0x28] sm:$0xff] %v435_v13  ;;  %v400_v24 = vmul.f32 2.0, %v196_v20  ;;  %v404_v25 = vmul.f32 2.0, %v206_v21 }
  0xd0   :  { %v423_v26 = vsub.f32 %v375_v16, %v407_v18  ;;  %v427_v27 = vsub.f32 %v379_v17, %v411_v19 }
  0xd1   :  { %v416_v28 = vsub.f32 %v368_v22, %v400_v24  ;;  %v420_v29 = vsub.f32 %v372_v23, %v404_v25 }
  0xd2   :  { %v439_v30 = vmax.f32 %v423_v26, 1e-12  ;;  %v443_v31 = vmax.f32 %v427_v27, 1e-12 }
  0xd3   :  { %v432_v33 = vmax.f32 %v416_v28, 1e-12  ;;  %v436_v35 = vmax.f32 %v420_v29, 1e-12 }
  0xd4   :  { %455 = vst [vmem:[#allocation3 + $0x48] sm:$0xff] %v439_v30 }
  0xd5   :  { %459 = vst [vmem:[#allocation3 + $0x68] sm:$0xff] %v443_v31  ;;  %v216_v36 = vpop.f32.mrf.mxu2  ;;  %v226_v39 = vpop.f32.mrf.mxu3 }
  0xd6   :  { %448 = vst [vmem:[#allocation3 + $0x10] sm:$0xff] %v432_v33  ;;  %v408_v41 = vmul.f32 2.0, %v216_v36  ;;  %v412_v43 = vmul.f32 2.0, %v226_v39  ;;  %v198_v44 = vpop.f32.mrf.mxu0  ;;  %v208_v45 = vpop.f32.mrf.mxu1 }
  0xd7   :  { %452 = vst [vmem:[#allocation3 + $0x30] sm:$0xff] %v436_v35  ;;  %v401_v48 = vmul.f32 2.0, %v198_v44  ;;  %v405_v49 = vmul.f32 2.0, %v208_v45 }
  0xd8   :  { %v424_v51 = vsub.f32 %v376_v34, %v408_v41  ;;  %v428_v52 = vsub.f32 %v380_v38, %v412_v43 }
  0xd9   :  { %v417_v53 = vsub.f32 %v369_v46, %v401_v48  ;;  %v421_v50 = vsub.f32 %v373_v47, %v405_v49 }
  0xda   :  { %v440_v54 = vmax.f32 %v424_v51, 1e-12  ;;  %v444_v55 = vmax.f32 %v428_v52, 1e-12 }
  0xdb   :  { %v433_v57 = vmax.f32 %v417_v53, 1e-12  ;;  %v437_v58 = vmax.f32 %v421_v50, 1e-12 }
  0xdc   :  { %456 = vst [vmem:[#allocation3 + $0x50] sm:$0xff] %v440_v54 }
  0xdd   :  { %460 = vst [vmem:[#allocation3 + $0x70] sm:$0xff] %v444_v55  ;;  %v218_v59 = vpop.f32.mrf.mxu2  ;;  %v228_v60 = vpop.f32.mrf.mxu3 }
  0xde   :  { %449 = vst [vmem:[#allocation3 + $0x18] sm:$0xff] %v433_v57  ;;  %v409_v61 = vmul.f32 2.0, %v218_v59  ;;  %v413_v62 = vmul.f32 2.0, %v228_v60 }
  0xdf   :  { %453 = vst [vmem:[#allocation3 + $0x38] sm:$0xff] %v437_v58 }
  0xe0   :  { %v425_v63 = vsub.f32 %v377_v37, %v409_v61  ;;  %v429_v0 = vsub.f32 %v381_v40, %v413_v62 }
  0xe2   :  { %v441_v1 = vmax.f32 %v425_v63, 1e-12  ;;  %v445_v2 = vmax.f32 %v429_v0, 1e-12 }
  0xe4   :  { %457 = vst [vmem:[#allocation3 + $0x58] sm:$0xff] %v441_v1 }
  0xe5   :  { %461 = vst [vmem:[#allocation3 + $0x78] sm:$0xff] %v445_v2 }
  0xe6   :  { %474 = dma.vmem_to_hbm [thread:$0]  %s467_s3, 2048, %s469_s29, [#allocation4], %s620_s30, %s620_s30, %s621_s5  }
  0xe7   :  { %616 = dma.done.wait [#allocation4], 2048  }
  0xe8   :  { %617 = vsyncadd [#allocation4], 4294965248 }
  0xe9   :  { %479 = vsyncpa [#allocation4], 1 }

</bundles_post_ra>
